<compile_context>
chip_gen: v7x
topology: tpu7x:2x2x1
jax: 0.10.0
libtpu: 0.0.40
codegen_flags: <defaults>
</compile_context>

<pallas_src>
import functools
import math

import jax
import jax.numpy as jnp
from jax import lax
from jax.experimental import pallas as pl
from jax.experimental.pallas import tpu as pltpu

LANE = 128
SUBLANE = 8


def _round_up(x, m):
    return ((x + m - 1) // m) * m


# ----------------------------------------------------------------------------
# Kernel: fused multi-layer Linear(+ReLU) on one (tile_m, in_pad) row block.
# Weights are (in_pad_i, out_pad_i) — already transposed & zero-padded.
# ----------------------------------------------------------------------------
def _mlp_kernel(num_layers, x_ref, b_ref, *rest):
    w_refs = rest[:num_layers]
    out_ref = rest[num_layers]

    h = x_ref[...]                       # (tile_m, in_pad) f32
    b_all = b_ref[...]                   # (num_layers, max_pad) f32

    for i in range(num_layers):          # unrolled Python loop (tiny layer count)
        w = w_refs[i][...]               # (K_pad, N_pad)
        h = lax.dot_general(
            h, w,
            dimension_numbers=(((1,), (0,)), ((), ())),
            preferred_element_type=jnp.float32,
            precision=lax.Precision.HIGHEST,
        )
        h = h + b_all[i, :w.shape[1]][None, :]
        if i < num_layers - 1:
            h = jnp.maximum(h, 0.0)      # ReLU on all but the last layer

    out_ref[...] = h.astype(out_ref.dtype)


# ----------------------------------------------------------------------------
# One-time parameter packing (outside the hot path):
#   - transpose torch-layout (out, in) -> (in, out)
#   - zero-pad every feature dim up to a multiple of 128 lanes
#   - stack biases into one (num_layers, max_pad) slab (single DMA descriptor)
# ----------------------------------------------------------------------------
def pack_mlp_params(weights, biases, param_dtype=jnp.float32):
    in_dims = [int(w.shape[1]) for w in weights]
    out_dims = [int(w.shape[0]) for w in weights]
    in_pads = [_round_up(d, LANE) for d in in_dims]
    out_pads = [_round_up(d, LANE) for d in out_dims]
    max_pad = max(out_pads)

    w_packed = []
    for w, kp, npad in zip(weights, in_pads, out_pads):
        wt = jnp.transpose(w.astype(param_dtype))              # (in, out)
        wt = jnp.pad(wt, ((0, kp - wt.shape[0]), (0, npad - wt.shape[1])))
        w_packed.append(wt)

    b_packed = jnp.stack(
        [jnp.pad(b.astype(jnp.float32), (0, max_pad - b.shape[0])) for b in biases],
        axis=0,
    )

    meta = dict(
        in_dim=in_dims[0],
        out_dim=out_dims[-1],
        in_pad=in_pads[0],
        out_pad=out_pads[-1],
    )
    return w_packed, b_packed, meta


# ----------------------------------------------------------------------------
# Wrapper: x of shape (..., input_dim) -> (..., output_dim)
# ----------------------------------------------------------------------------
def mlp_forward(x, w_packed, b_packed, meta, *, tile_m=512):
    num_layers = len(w_packed)
    in_dim, out_dim = meta["in_dim"], meta["out_dim"]
    in_pad, out_pad = meta["in_pad"], meta["out_pad"]

    *lead, d = x.shape
    assert d == in_dim, (d, in_dim)
    M = int(math.prod(lead)) if lead else 1

    # Row tile: multiple of 8 sublanes, capped at tile_m; pad M up to it.
    tm = min(tile_m, _round_up(M, SUBLANE))
    m_pad = _round_up(M, tm)

    x2 = x.reshape(M, in_dim).astype(jnp.float32)
    x2 = jnp.pad(x2, ((0, m_pad - M), (0, in_pad - in_dim)))

    grid = (m_pad // tm,)
    kernel = functools.partial(_mlp_kernel, num_layers)

    # Input row blocks march with the grid; params use a constant index_map so
    # they are fetched once and stay VMEM-resident across all grid steps.
    in_specs = [pl.BlockSpec((tm, in_pad), lambda i: (i, 0)),
                pl.BlockSpec(b_packed.shape, lambda i: (0, 0))]
    in_specs += [pl.BlockSpec(w.shape, lambda i: (0, 0)) for w in w_packed]

    # VMEM budget: double-buffered x/out blocks + resident params + headroom
    # for the f32 intermediates (safe under v7x's 64 MiB physical VMEM).
    itemsize = 4
    max_pad = b_packed.shape[1]
    vmem_need = itemsize * (
        2 * tm * in_pad
        + 2 * tm * out_pad
        + sum(int(w.size) for w in w_packed)
        + int(b_packed.size)
        + 2 * tm * max_pad
    )
    vmem_limit = int(min(max(2 * vmem_need, 16 * 1024 * 1024), 64 * 1024 * 1024))

    out2 = pl.pallas_call(
        kernel,
        out_shape=jax.ShapeDtypeStruct((m_pad, out_pad), x.dtype),
        grid=grid,
        in_specs=in_specs,
        out_specs=pl.BlockSpec((tm, out_pad), lambda i: (i, 0)),
        compiler_params=pltpu.CompilerParams(
            dimension_semantics=("parallel",),   # shards row blocks across v7x's 2 TCs
            vmem_limit_bytes=vmem_limit,
        ),
    )(x2, b_packed, *w_packed)

    out = out2[:M, :out_dim]
    return out.reshape(*lead, out_dim)


# ----------------------------------------------------------------------------
# Pure-JAX reference (mirrors the PyTorch MLP.forward)
# ----------------------------------------------------------------------------
def reference(x, weights, biases):
    n = len(weights)
    h = x
    for i, (w, b) in enumerate(zip(weights, biases)):
        h = jnp.matmul(h, w.T, precision=lax.Precision.HIGHEST) + b
        if i < n - 1:
            h = jnp.maximum(h, 0.0)
    return h


if __name__ == "__main__":
    # MLP(32, 64, 32, num_layers=3) applied to x of shape (batch=2, seq=8, 32).
    input_dim, hidden_dim, output_dim, num_layers = 32, 64, 32, 3
    batch, seq = 2, 8

    dims = [input_dim] + [hidden_dim] * (num_layers - 1) + [output_dim]

    key = jax.random.PRNGKey(0)
    keys = jax.random.split(key, 2 * num_layers + 1)

    # nn.Linear default init: kaiming-uniform(a=sqrt(5)) weight, uniform bias,
    # both bounded by 1/sqrt(fan_in); torch layout (out, in).
    weights, biases = [], []
    for i in range(num_layers):
        fan_in, fan_out = dims[i], dims[i + 1]
        bound = 1.0 / math.sqrt(fan_in)
        weights.append(jax.random.uniform(keys[2 * i], (fan_out, fan_in),
                                          jnp.float32, -bound, bound))
        biases.append(jax.random.uniform(keys[2 * i + 1], (fan_out,),
                                         jnp.float32, -bound, bound))

    x = jax.random.normal(keys[-1], (batch, seq, input_dim), jnp.float32)

    # Pack parameters once, outside the hot path.
    w_packed, b_packed, meta = pack_mlp_params(weights, biases)

    out = mlp_forward(x, w_packed, b_packed, meta)
    out = jax.block_until_ready(out)

    ref = reference(x, weights, biases)
    assert out.shape == (batch, seq, output_dim), out.shape
    err = float(jnp.max(jnp.abs(out - ref)))
    assert jnp.allclose(out, ref, atol=1e-3, rtol=1e-3), err

    print("KERNEL_OK")
</pallas_src>

<mosaic_0001>
module attributes {stable_mosaic.version = 11 : i64} {
  func.func @_mlp_kernel(%arg0: i32, %arg1: memref<16x128xf32, #tpu.memory_space<vmem>>, %arg2: memref<3x128xf32, #tpu.memory_space<vmem>>, %arg3: memref<128x128xf32, #tpu.memory_space<vmem>>, %arg4: memref<128x128xf32, #tpu.memory_space<vmem>>, %arg5: memref<128x128xf32, #tpu.memory_space<vmem>>, %arg6: memref<16x128xf32, #tpu.memory_space<vmem>>) attributes {dimension_semantics = [#tpu.dimension_semantics<parallel>], iteration_bounds = array<i64: 1>, scalar_prefetch = 0 : i64, scratch_operands = 0 : i64, tpu.core_type = #tpu.core_type<tc>, window_params = [{transform_indices = @transform_0, window_bounds = array<i64: 16, 128>}, {pipeline_mode = #tpu.pipeline_mode<synchronous>, transform_indices = @transform_1, window_bounds = array<i64: 3, 128>}, {pipeline_mode = #tpu.pipeline_mode<synchronous>, transform_indices = @transform_2, window_bounds = array<i64: 128, 128>}, {pipeline_mode = #tpu.pipeline_mode<synchronous>, transform_indices = @transform_3, window_bounds = array<i64: 128, 128>}, {pipeline_mode = #tpu.pipeline_mode<synchronous>, transform_indices = @transform_4, window_bounds = array<i64: 128, 128>}, {transform_indices = @transform_5, window_bounds = array<i64: 16, 128>}]} {
    %c0 = arith.constant 0 : index
    %c0_0 = arith.constant 0 : index
    %0 = vector.load %arg1[%c0, %c0_0] : memref<16x128xf32, #tpu.memory_space<vmem>>, vector<16x128xf32>
    %c0_1 = arith.constant 0 : index
    %c0_2 = arith.constant 0 : index
    %1 = vector.load %arg2[%c0_1, %c0_2] : memref<3x128xf32, #tpu.memory_space<vmem>>, vector<3x128xf32>
    %c0_3 = arith.constant 0 : index
    %c0_4 = arith.constant 0 : index
    %2 = vector.load %arg3[%c0_3, %c0_4] : memref<128x128xf32, #tpu.memory_space<vmem>>, vector<128x128xf32>
    %cst = arith.constant dense<0.000000e+00> : vector<16x128xf32>
    %3 = tpu.matmul %0, %2, %cst {dimension_numbers = #tpu.dot_dimension_numbers<[1], [0], [0], [1], [0, 0, 1, 1], [], []>, precision = #tpu.contract_precision<fp32>} : vector<16x128xf32>, vector<128x128xf32>, vector<16x128xf32> -> vector<16x128xf32>
    %4 = vector.extract_strided_slice %1 {offsets = [0, 0], sizes = [1, 128], strides = [1, 1]} : vector<3x128xf32> to vector<1x128xf32>
    %5 = vector.shape_cast %4 : vector<1x128xf32> to vector<128xf32>
    %6 = vector.shape_cast %5 : vector<128xf32> to vector<1x128xf32>
    %7 = vector.broadcast %6 : vector<1x128xf32> to vector<16x128xf32>
    %8 = arith.addf %3, %7 : vector<16x128xf32>
    %cst_5 = arith.constant 0.000000e+00 : f32
    %9 = vector.broadcast %cst_5 : f32 to vector<16x128xf32>
    %10 = arith.maximumf %8, %9 : vector<16x128xf32>
    %c0_6 = arith.constant 0 : index
    %c0_7 = arith.constant 0 : index
    %11 = vector.load %arg4[%c0_6, %c0_7] : memref<128x128xf32, #tpu.memory_space<vmem>>, vector<128x128xf32>
    %cst_8 = arith.constant dense<0.000000e+00> : vector<16x128xf32>
    %12 = tpu.matmul %10, %11, %cst_8 {dimension_numbers = #tpu.dot_dimension_numbers<[1], [0], [0], [1], [0, 0, 1, 1], [], []>, precision = #tpu.contract_precision<fp32>} : vector<16x128xf32>, vector<128x128xf32>, vector<16x128xf32> -> vector<16x128xf32>
    %13 = vector.extract_strided_slice %1 {offsets = [1, 0], sizes = [1, 128], strides = [1, 1]} : vector<3x128xf32> to vector<1x128xf32>
    %14 = vector.shape_cast %13 : vector<1x128xf32> to vector<128xf32>
    %15 = vector.shape_cast %14 : vector<128xf32> to vector<1x128xf32>
    %16 = vector.broadcast %15 : vector<1x128xf32> to vector<16x128xf32>
    %17 = arith.addf %12, %16 : vector<16x128xf32>
    %cst_9 = arith.constant 0.000000e+00 : f32
    %18 = vector.broadcast %cst_9 : f32 to vector<16x128xf32>
    %19 = arith.maximumf %17, %18 : vector<16x128xf32>
    %c0_10 = arith.constant 0 : index
    %c0_11 = arith.constant 0 : index
    %20 = vector.load %arg5[%c0_10, %c0_11] : memref<128x128xf32, #tpu.memory_space<vmem>>, vector<128x128xf32>
    %cst_12 = arith.constant dense<0.000000e+00> : vector<16x128xf32>
    %21 = tpu.matmul %19, %20, %cst_12 {dimension_numbers = #tpu.dot_dimension_numbers<[1], [0], [0], [1], [0, 0, 1, 1], [], []>, precision = #tpu.contract_precision<fp32>} : vector<16x128xf32>, vector<128x128xf32>, vector<16x128xf32> -> vector<16x128xf32>
    %22 = vector.extract_strided_slice %1 {offsets = [2, 0], sizes = [1, 128], strides = [1, 1]} : vector<3x128xf32> to vector<1x128xf32>
    %23 = vector.shape_cast %22 : vector<1x128xf32> to vector<128xf32>
    %24 = vector.shape_cast %23 : vector<128xf32> to vector<1x128xf32>
    %25 = vector.broadcast %24 : vector<1x128xf32> to vector<16x128xf32>
    %26 = arith.addf %21, %25 : vector<16x128xf32>
    %c0_13 = arith.constant 0 : index
    %c0_14 = arith.constant 0 : index
    %27 = vector.load %arg6[%c0_13, %c0_14] : memref<16x128xf32, #tpu.memory_space<vmem>>, vector<16x128xf32>
    tpu.vector_store %arg6[%c0_13, %c0_14], %26 {strides = array<i32>} : memref<16x128xf32, #tpu.memory_space<vmem>>, vector<16x128xf32>,
    return
  }
  func.func @transform_0(%arg0: i32) -> (i32, i32) {
    %c0_i32 = arith.constant 0 : i32
    %c0_i32_0 = arith.constant 0 : i32
    return %arg0, %c0_i32 : i32, i32
  }
  func.func @transform_1(%arg0: i32) -> (i32, i32) {
    %c0_i32 = arith.constant 0 : i32
    %c0_i32_0 = arith.constant 0 : i32
    %c0_i32_1 = arith.constant 0 : i32
    return %c0_i32, %c0_i32_0 : i32, i32
  }
  func.func @transform_2(%arg0: i32) -> (i32, i32) {
    %c0_i32 = arith.constant 0 : i32
    %c0_i32_0 = arith.constant 0 : i32
    %c0_i32_1 = arith.constant 0 : i32
    return %c0_i32, %c0_i32_0 : i32, i32
  }
  func.func @transform_3(%arg0: i32) -> (i32, i32) {
    %c0_i32 = arith.constant 0 : i32
    %c0_i32_0 = arith.constant 0 : i32
    %c0_i32_1 = arith.constant 0 : i32
    return %c0_i32, %c0_i32_0 : i32, i32
  }
  func.func @transform_4(%arg0: i32) -> (i32, i32) {
    %c0_i32 = arith.constant 0 : i32
    %c0_i32_0 = arith.constant 0 : i32
    %c0_i32_1 = arith.constant 0 : i32
    return %c0_i32, %c0_i32_0 : i32, i32
  }
  func.func @transform_5(%arg0: i32) -> (i32, i32) {
    %c0_i32 = arith.constant 0 : i32
    %c0_i32_0 = arith.constant 0 : i32
    return %arg0, %c0_i32 : i32, i32
  }
}

</mosaic_0001>

<bundles_post_ra>
// kernel: tpu_custom_call.1
= control target key start
LH: loop header
LB: loop body
LE: loop exit
PB: predicated region body
PF: predicated region fallthrough
CT: control target
= control target key end

     0   :  { %10 = vsyncpa [#allocation3], 0  ;;  %s5006_s0 = inlined_call_operand.hbm [shape: f32[16,128], index: 0, kind: input, shape index: {}]   ;;  %s5007_s1 = inlined_call_operand.hbm [shape: f32[3,128], index: 1, kind: input, shape index: {}]   ;;  %s5008_s2 = inlined_call_operand.hbm [shape: f32[128,128], index: 2, kind: input, shape index: {}]   ;;  %s5009_s3 = inlined_call_operand.hbm [shape: f32[128,128], index: 3, kind: input, shape index: {}]   ;;  %s5010_s4 = inlined_call_operand.hbm [shape: f32[128,128], index: 4, kind: input, shape index: {}]   ;;  %s5011_s5 = inlined_call_operand.hbm [shape: f32[16,128], index: 5, kind: output, shape index: {}]  }
   0x1   :  { %11 = vsyncpa [#allocation6], 0 }
   0x2   :  { %12 = vsyncpa [#allocation9], 0 }
   0x3   :  { %13 = vsyncpa [#allocation4], 0  ;;  %s3941_s18 = smov [#allocation5]   ;;  %s3801_s22 = scalar_lea.hbm %s5007_s1, 64 }
   0x4   :  { %s32_s19 = sshll.u32 %s3941_s18, 4  ;;  %p3802_p0 = scmp.ne.s32.totalorder %s5007_s1, %s3801_s22  ;;  %s33_s19 = int_to_ptr.vmem [resolvable:$true] %s32_s19 }
   0x5   :  { %p3805_p1 = scmp.lt.u32.totalorder %s3801_s22, %s5007_s1 }
   0x7   :  { %p3807_p2 = pnand %p3805_p1, %p3802_p0 }
   0x9   :  { %3810 = shalt.err (!%p3807_p2)
}
   0xa   :  { %s3811_s27 = scalar_lea.vmem %s33_s19, 64  ;;  %p3816_p4 = scmp.lt.s32.totalorder %s33_s19, %s33_s19 }
   0xb   :  { %p3812_p3 = scmp.ne.s32.totalorder %s33_s19, %s3811_s27  ;;  %p3817_p5 = scmp.lt.s32.totalorder %s3811_s27, %s3811_s27 }
   0xd   :  { %p3818_p6 = por %p3817_p5, %p3816_p4 }
   0xf   :  { %p3819_p7 = pnand %p3818_p6, %p3812_p3 }
  0x11   :  { %3822 = shalt.err (!%p3819_p7)
}
  0x12   :  { %35 = dma.hbm_to_vmem [thread:$0]  %s5007_s1, 64, %s33_s19, [#allocation6]  }
  0x13   :  { %s3942_s30 = smov [#allocation8]   ;;  %s3943_s7 = smov [#allocation2]  }
  0x14   :  { %s53_s6 = sshll.u32 %s3942_s30, 4  ;;  %s19_s8 = sshll.u32 %s3943_s7, 4  ;;  %s54_s6 = int_to_ptr.vmem [resolvable:$true] %s53_s6  ;;  %s20_s8 = int_to_ptr.vmem [resolvable:$true] %s19_s8 }
  0x15   :  { %s3823_s11 = scalar_lea.hbm %s5009_s3, 2048 }
  0x16   :  { %p3824_p8 = scmp.ne.s32.totalorder %s5009_s3, %s3823_s11  ;;  %p3827_p9 = scmp.lt.u32.totalorder %s3823_s11, %s5009_s3 }
  0x18   :  { %p3829_p10 = pnand %p3827_p9, %p3824_p8 }
  0x1a   :  { %3832 = shalt.err (!%p3829_p10)
}
  0x1b   :  { %s3833_s1 = scalar_lea.vmem %s54_s6, 2048  ;;  %p3838_p12 = scmp.lt.s32.totalorder %s54_s6, %s54_s6 }
  0x1c   :  { %p3834_p11 = scmp.ne.s32.totalorder %s54_s6, %s3833_s1  ;;  %p3839_p13 = scmp.lt.s32.totalorder %s3833_s1, %s3833_s1 }
  0x1e   :  { %p3840_p0 = por %p3839_p13, %p3838_p12 }
  0x20   :  { %p3841_p1 = pnand %p3840_p0, %p3834_p11 }
  0x22   :  { %3844 = shalt.err (!%p3841_p1)
}
  0x23   :  { %s3944_s16 = smov 128   ;;  %s3945_s17 = smov 8  }
  0x24   :  { %59 = dma.hbm_to_vmem [thread:$0]  %s5009_s3, 2048, %s54_s6, [#allocation9], %s3944_s16, %s3944_s16, %s3945_s17  }
  0x25   :  { %s3845_s22 = scalar_lea.hbm %s5006_s0, 256 }
  0x26   :  { %p3846_p2 = scmp.ne.s32.totalorder %s5006_s0, %s3845_s22  ;;  %p3849_p3 = scmp.lt.u32.totalorder %s3845_s22, %s5006_s0 }
  0x28   :  { %p3851_p4 = pnand %p3849_p3, %p3846_p2 }
  0x2a   :  { %3854 = shalt.err (!%p3851_p4)
}
  0x2b   :  { %s3855_s27 = scalar_lea.vmem %s20_s8, 256  ;;  %p3860_p6 = scmp.lt.s32.totalorder %s20_s8, %s20_s8 }
  0x2c   :  { %p3856_p5 = scmp.ne.s32.totalorder %s20_s8, %s3855_s27  ;;  %p3861_p7 = scmp.lt.s32.totalorder %s3855_s27, %s3855_s27 }
  0x2e   :  { %p3862_p8 = por %p3861_p7, %p3860_p6 }
  0x30   :  { %p3863_p9 = pnand %p3862_p8, %p3856_p5 }
  0x32   :  { %3866 = shalt.err (!%p3863_p9)
}
  0x33   :  { %25 = dma.hbm_to_vmem [thread:$0]  %s5006_s0, 256, %s20_s8, [#allocation3], %s3944_s16, %s3944_s16, %s3945_s17  }
  0x34   :  { %s3946_s29 = smov [#allocation7]   ;;  %s3947_s6 = smov [#allocation10]  }
  0x35   :  { %s41_s30 = sshll.u32 %s3946_s29, 4  ;;  %s65_s7 = sshll.u32 %s3947_s6, 4  ;;  %s42_s30 = int_to_ptr.vmem [resolvable:$true] %s41_s30  ;;  %s66_s7 = int_to_ptr.vmem [resolvable:$true] %s65_s7 }
  0x36   :  { %s3867_s11 = scalar_lea.hbm %s5008_s2, 2048 }
  0x37   :  { %p3868_p10 = scmp.ne.s32.totalorder %s5008_s2, %s3867_s11  ;;  %p3871_p11 = scmp.lt.u32.totalorder %s3867_s11, %s5008_s2 }
  0x39   :  { %p3873_p12 = pnand %p3871_p11, %p3868_p10 }
  0x3b   :  { %3876 = shalt.err (!%p3873_p12)
}
  0x3c   :  { %s3877_s0 = scalar_lea.vmem %s42_s30, 2048  ;;  %p3882_p0 = scmp.lt.s32.totalorder %s42_s30, %s42_s30 }
  0x3d   :  { %p3878_p13 = scmp.ne.s32.totalorder %s42_s30, %s3877_s0  ;;  %p3883_p1 = scmp.lt.s32.totalorder %s3877_s0, %s3877_s0 }
  0x3f   :  { %p3884_p2 = por %p3883_p1, %p3882_p0 }
  0x41   :  { %p3885_p3 = pnand %p3884_p2, %p3878_p13 }
  0x43   :  { %3888 = shalt.err (!%p3885_p3)
}
  0x44   :  { %47 = dma.hbm_to_vmem [thread:$0]  %s5008_s2, 2048, %s42_s30, [#allocation6], %s3944_s16, %s3944_s16, %s3945_s17  }
  0x45   :  { %s3889_s20 = scalar_lea.hbm %s5010_s4, 2048 }
  0x46   :  { %p3890_p4 = scmp.ne.s32.totalorder %s5010_s4, %s3889_s20  ;;  %p3893_p5 = scmp.lt.u32.totalorder %s3889_s20, %s5010_s4 }
  0x48   :  { %p3895_p6 = pnand %p3893_p5, %p3890_p4 }
  0x4a   :  { %3898 = shalt.err (!%p3895_p6)
}
  0x4b   :  { %s3899_s25 = scalar_lea.vmem %s66_s7, 2048  ;;  %p3904_p8 = scmp.lt.s32.totalorder %s66_s7, %s66_s7 }
  0x4c   :  { %p3900_p7 = scmp.ne.s32.totalorder %s66_s7, %s3899_s25  ;;  %p3905_p9 = scmp.lt.s32.totalorder %s3899_s25, %s3899_s25 }
  0x4e   :  { %p3906_p10 = por %p3905_p9, %p3904_p8 }
  0x50   :  { %p3907_p11 = pnand %p3906_p10, %p3900_p7 }
  0x52   :  { %3910 = shalt.err (!%p3907_p11)
}
  0x53   :  { %71 = dma.hbm_to_vmem [thread:$0]  %s5010_s4, 2048, %s66_s7, [#allocation9], %s3944_s16, %s3944_s16, %s3945_s17  }
  0x54   :  { %3933 = dma.done.wait [#allocation3], 256  }
  0x55   :  { %3934 = vsyncadd [#allocation3], 4294967040 }
  0x56   :  { %3935 = dma.done.wait [#allocation6], 2112  }
  0x57   :  { %3936 = vsyncadd [#allocation6], 4294965184 }
  0x58   :  { %3937 = dma.done.wait [#allocation9], 4096  }
  0x59   :  { %3938 = vsyncadd [#allocation9], 4294963200  ;;  %v90_v0 = vld [vmem:[#allocation7] sm:$0xff]  ;;  %v91_v1 = vld [vmem:[#allocation7 + $0x8] sm:$0xff]  ;;  %s3948_s4 = smov [#allocation11]  }
  0x5a   :  { %v92_v2 = vld [vmem:[#allocation7 + $0x10] sm:$0xff]  ;;  %v111_v3 = vand.u32 4294901760, %v90_v0  ;;  %v114_v4 = vand.u32 4294901760, %v91_v1  ;;  %v4051_v5 = vld [vmem:[#allocation7 + $0x18] sm:$0xff]  ;;  %v4053_v7 = vld [vmem:[#allocation7 + $0x20] sm:$0xff]  ;;  %s2213_s27 = sshll.u32 %s3948_s4, 4  ;;  %s2214_s27 = int_to_ptr.vmem [resolvable:$true] %s2213_s27 }
  0x5b   :  { %v117_v6 = vand.u32 4294901760, %v92_v2  ;;  %v4055_v8 = vld [vmem:[#allocation7 + $0x28] sm:$0xff]  ;;  %v120_v9 = vand.u32 4294901760, %v4051_v5  ;;  %v123_v11 = vand.u32 4294901760, %v4053_v7  ;;  %v4064_v14 = vld [vmem:[#allocation7 + $0x30] sm:$0xff]  ;;  %v4066_v15 = vld [vmem:[#allocation7 + $0x38] sm:$0xff]  ;;  %p3916_p13 = scmp.lt.s32.totalorder %s2214_s27, %s2214_s27 }
  0x5c   :  { %v4058_v10 = vpack.c.bf16 %v114_v4, %v111_v3  ;;  %v126_v12 = vand.u32 4294901760, %v4055_v8  ;;  %v87_v16 = vld [vmem:[#allocation2] sm:$0xff]  ;;  %v129_v19 = vand.u32 4294901760, %v4064_v14  ;;  %v132_v20 = vand.u32 4294901760, %v4066_v15  ;;  %v4084_v21 = vld [vmem:[#allocation7 + $0x40] sm:$0xff]  ;;  %v4106_v29 = vld [vmem:[#allocation7 + $0x58] sm:$0xff] }
  0x5d   :  { %v4062_v13 = vpack.c.bf16 %v120_v9, %v117_v6  ;;  %v4072_v17 = vand.u32 4294901760, %v87_v16  ;;  %v4086_v22 = vld [vmem:[#allocation7 + $0x48] sm:$0xff]  ;;  %v135_v26 = vand.u32 4294901760, %v4084_v21  ;;  %v4104_v28 = vld [vmem:[#allocation7 + $0x50] sm:$0xff]  ;;  %v144_v35 = vand.u32 4294901760, %v4106_v29  ;;  %v4121_v36 = vld [vmem:[#allocation7 + $0x60] sm:$0xff] }
  0x5e   :  { %3182 = vmatprep.subr.bf16.mxu1 %v4058_v10  ;;  %3278 = vmatprep.subr.bf16.mxu0 %v4058_v10  ;;  %v4080_v18 = vpack.c.bf16 %v126_v12, %v123_v11  ;;  %v4100_v25 = vpack.c.bf16 %v132_v20, %v129_v19  ;;  %v138_v27 = vand.u32 4294901760, %v4086_v22  ;;  %v141_v31 = vand.u32 4294901760, %v4104_v28  ;;  %v88_v33 = vld [vmem:[#allocation2 + $0x8] sm:$0xff]  ;;  %v4123_v37 = vld [vmem:[#allocation7 + $0x68] sm:$0xff]  ;;  %s3911_s3 = scalar_lea.vmem %s2214_s27, 256 }
  0x5f   :  { %3184 = vmatpush3.bf16.msra.mxu1 %v4058_v10  ;;  %3280 = vmatpush3.bf16.msra.mxu0 %v4058_v10  ;;  %v4089_v23 = vsub.f32 %v87_v16, %v4072_v17  ;;  %v4125_v38 = vsub.f32 %v90_v0, %v111_v3  ;;  %v4127_v39 = vsub.f32 %v91_v1, %v114_v4  ;;  %v4129_v40 = vand.u32 4294901760, %v88_v33  ;;  %v4135_v43 = vld [vmem:[#allocation7 + $0x70] sm:$0xff]  ;;  %v4137_v44 = vld [vmem:[#allocation7 + $0x78] sm:$0xff]  ;;  %p3912_p12 = scmp.ne.s32.totalorder %s2214_s27, %s3911_s3  ;;  %p3917_p0 = scmp.lt.s32.totalorder %s3911_s3, %s3911_s3 }
  0x60   :  { %3186 = vmatprep.subr.bf16.mxu1 %v4062_v13  ;;  %3282 = vmatprep.subr.bf16.mxu0 %v4062_v13  ;;  %v4118_v34 = vpack.c.bf16 %v138_v27, %v135_v26  ;;  %v147_v41 = vand.u32 4294901760, %v4121_v36  ;;  %v150_v42 = vand.u32 4294901760, %v4123_v37  ;;  %v4139_v45 = vsub.f32 %v92_v2, %v117_v6 }
  0x61   :  { %v193_v24 = vand.u32 4294901760, %v4089_v23  ;;  %v4147_v46 = vpack.c.bf16 %v144_v35, %v141_v31  ;;  %v214_v47 = vand.u32 4294901760, %v4125_v38  ;;  %v221_v48 = vand.u32 4294901760, %v4127_v39  ;;  %p3918_p1 = por %p3917_p0, %p3916_p13 }
  0x62   :  { %v4152_v49 = vsub.f32 %v4051_v5, %v120_v9  ;;  %v153_v50 = vand.u32 4294901760, %v4135_v43  ;;  %v156_v51 = vand.u32 4294901760, %v4137_v44  ;;  %v4157_v52 = vsub.f32 %v88_v33, %v4129_v40 }
  0x63   :  { %3188 = vmatpush3.bf16.msra.mxu1 %v4062_v13  ;;  %3284 = vmatpush3.bf16.msra.mxu0 %v4062_v13  ;;  %v194_v30 = vsub.f32 %v4089_v23, %v193_v24  ;;  %v4165_v53 = vpack.c.bf16 %v150_v42, %v147_v41  ;;  %v228_v54 = vand.u32 4294901760, %v4139_v45  ;;  %v4171_v55 = vsub.f32 %v4053_v7, %v123_v11  ;;  %p3919_p2 = pnand %p3918_p1, %p3912_p12 }
  0x64   :  { %3190 = vmatprep.subr.bf16.mxu1 %v4080_v18  ;;  %3286 = vmatprep.subr.bf16.mxu0 %v4080_v18  ;;  %v215_v56 = vsub.f32 %v4125_v38, %v214_v47  ;;  %v222_v57 = vsub.f32 %v4127_v39, %v221_v48  ;;  %v235_v58 = vand.u32 4294901760, %v4152_v49  ;;  %v4181_v59 = vsub.f32 %v4055_v8, %v126_v12 }
  0x65   :  { %2688 = vmatprep.mubr.f32.mxu0 %v193_v24  ;;  %v195_v32 = vand.u32 4294901760, %v194_v30  ;;  %v4187_v60 = vpack.c.bf16 %v156_v51, %v153_v50  ;;  %v203_v61 = vand.u32 4294901760, %v4157_v52  ;;  %v229_v62 = vsub.f32 %v4139_v45, %v228_v54 }
  0x66   :  { %v242_v63 = vand.u32 4294901760, %v4171_v55  ;;  %v4197_v0 = vsub.f32 %v4064_v14, %v129_v19  ;;  %v4202_v1 = vsub.f32 %v4066_v15, %v132_v20  ;;  %v216_v2 = vand.u32 4294901760, %v215_v56 }
  0x67   :  { %3192 = vmatpush3.bf16.msra.mxu1 %v4080_v18  ;;  %3288 = vmatpush3.bf16.msra.mxu0 %v4080_v18  ;;  %v223_v3 = vand.u32 4294901760, %v222_v57  ;;  %v236_v4 = vsub.f32 %v4152_v49, %v235_v58  ;;  %v249_v5 = vand.u32 4294901760, %v4181_v59  ;;  %v3309_v6 = vpack.c.bf16 %v221_v48, %v214_v47 }
  0x68   :  { %3194 = vmatprep.subr.bf16.mxu1 %v4100_v25  ;;  %3290 = vmatprep.subr.bf16.mxu0 %v4100_v25  ;;  %v204_v7 = vsub.f32 %v4157_v52, %v203_v61  ;;  %v4212_v8 = vsub.f32 %v4084_v21, %v135_v26  ;;  %v230_v9 = vand.u32 4294901760, %v229_v62  ;;  %v243_v11 = vsub.f32 %v4171_v55, %v242_v63 }
  0x69   :  { %2583 = vmatprep.mubr.f32.mxu1 %v195_v32  ;;  %v256_v12 = vand.u32 4294901760, %v4197_v0  ;;  %v263_v14 = vand.u32 4294901760, %v4202_v1  ;;  %v3213_v15 = vpack.c.bf16 %v223_v3, %v216_v2  ;;  %v237_v16 = vand.u32 4294901760, %v236_v4 }
  0x6a   :  { %v250_v19 = vsub.f32 %v4181_v59, %v249_v5  ;;  %v4225_v20 = vsub.f32 %v4086_v22, %v138_v27  ;;  %v205_v21 = vand.u32 4294901760, %v204_v7  ;;  %v3313_v24 = vpack.c.bf16 %v235_v58, %v228_v54 }
  0x6b   :  { %3196 = vmatpush3.bf16.msra.mxu1 %v4100_v25  ;;  %3292 = vmatpush3.bf16.msra.mxu0 %v4100_v25  ;;  %v270_v26 = vand.u32 4294901760, %v4212_v8  ;;  %v4231_v30 = vsub.f32 %v4104_v28, %v141_v31  ;;  %v257_v32 = vsub.f32 %v4197_v0, %v256_v12  ;;  %v264_v33 = vsub.f32 %v4202_v1, %v263_v14 }
  0x6c   :  { %3198 = vmatprep.subr.bf16.mxu1 %v4118_v34  ;;  %3294 = vmatprep.subr.bf16.mxu0 %v4118_v34  ;;  %v4240_v22 = vsub.f32 %v4106_v29, %v144_v35  ;;  %v3217_v27 = vpack.c.bf16 %v237_v16, %v230_v9  ;;  %v244_v47 = vand.u32 4294901760, %v243_v11  ;;  %v251_v48 = vand.u32 4294901760, %v250_v19 }
  0x6d   :  { %v277_v28 = vand.u32 4294901760, %v4225_v20  ;;  %v3317_v31 = vpack.c.bf16 %v249_v5, %v242_v63  ;;  %v271_v54 = vsub.f32 %v4212_v8, %v270_v26  ;;  %v4247_v56 = vsub.f32 %v4121_v36, %v147_v41 }
  0x6e   :  { %v258_v29 = vand.u32 4294901760, %v257_v32  ;;  %v265_v35 = vand.u32 4294901760, %v264_v33  ;;  %v284_v57 = vand.u32 4294901760, %v4231_v30  ;;  %v291_v58 = vand.u32 4294901760, %v4240_v22 }
  0x6f   :  { %3200 = vmatpush3.bf16.msra.mxu1 %v4118_v34  ;;  %3296 = vmatpush3.bf16.msra.mxu0 %v4118_v34  ;;  %v3221_v62 = vpack.c.bf16 %v251_v48, %v244_v47  ;;  %v4255_v63 = vsub.f32 %v4123_v37, %v150_v42  ;;  %v3321_v36 = vpack.c.bf16 %v263_v14, %v256_v12  ;;  %v272_v41 = vand.u32 4294901760, %v271_v54 }
  0x70   :  { %3202 = vmatprep.subr.bf16.mxu1 %v4147_v46  ;;  %3298 = vmatprep.subr.bf16.mxu0 %v4147_v46  ;;  %v3225_v2 = vpack.c.bf16 %v265_v35, %v258_v29  ;;  %v285_v3 = vsub.f32 %v4231_v30, %v284_v57  ;;  %v292_v4 = vsub.f32 %v4240_v22, %v291_v58  ;;  %v298_v5 = vand.u32 4294901760, %v4247_v56 }
  0x71   :  { %v305_v37 = vand.u32 4294901760, %v4255_v63  ;;  %v4266_v42 = vsub.f32 %v4135_v43, %v153_v50  ;;  %v4271_v7 = vsub.f32 %v4137_v44, %v156_v51  ;;  %v3325_v9 = vpack.c.bf16 %v277_v28, %v270_v26 }
  0x72   :  { %v286_v11 = vand.u32 4294901760, %v285_v3  ;;  %v293_v12 = vand.u32 4294901760, %v292_v4  ;;  %v299_v14 = vsub.f32 %v4247_v56, %v298_v5  ;;  %v3329_v51 = vpack.c.bf16 %v291_v58, %v284_v57  ;;  %v805_v57 = vld [vmem:[#allocation8 + $0x48] sm:$0xff]  ;;  %v808_v4 = vld [vmem:[#allocation8 + $0x60] sm:$0xff] }
  0x73   :  { %3204 = vmatpush3.bf16.msra.mxu1 %v4147_v46  ;;  %3300 = vmatpush3.bf16.msra.mxu0 %v4147_v46  ;;  %v306_v16 = vsub.f32 %v4255_v63, %v305_v37  ;;  %v312_v43 = vand.u32 4294901760, %v4266_v42  ;;  %v319_v50 = vand.u32 4294901760, %v4271_v7  ;;  %v3333_v33 = vpack.c.bf16 %v305_v37, %v298_v5  ;;  %v809_v5 = vld [vmem:[#allocation8 + $0x68] sm:$0xff] }
  0x74   :  { %3206 = vmatprep.subr.bf16.mxu1 %v4165_v53  ;;  %3302 = vmatprep.subr.bf16.mxu0 %v4165_v53  ;;  %v3233_v44 = vpack.c.bf16 %v293_v12, %v286_v11  ;;  %v300_v19 = vand.u32 4294901760, %v299_v14  ;;  %v3249_v54 = vpack.c.bf16 %v4152_v49, %v4139_v45  ;;  %v856_v37 = vand.u32 4294901760, %v809_v5  ;;  %v810_v11 = vld [vmem:[#allocation8 + $0x70] sm:$0xff]  ;;  %v811_v12 = vld [vmem:[#allocation8 + $0x78] sm:$0xff] }
  0x75   :  { %v320_v26 = vsub.f32 %v4271_v7, %v319_v50  ;;  %v859_v14 = vand.u32 4294901760, %v810_v11 }
  0x77   :  { %3208 = vmatpush3.bf16.msra.mxu1 %v4165_v53  ;;  %3304 = vmatpush3.bf16.msra.mxu0 %v4165_v53  ;;  %v321_v47 = vand.u32 4294901760, %v320_v26 }
  0x78   :  { %3210 = vmatprep.subr.bf16.mxu1 %v4187_v60  ;;  %3306 = vmatprep.subr.bf16.mxu0 %v4187_v60 }
  0x7b   :  { %3212 = vmatpush3.bf16.msra.mxu1 %v4187_v60  ;;  %3308 = vmatpush3.bf16.msra.mxu0 %v4187_v60 }
  0x7c   :  { %3214 = vmatprep.subr.bf16.mxu1 %v3213_v15  ;;  %3310 = vmatprep.subr.bf16.mxu0 %v3309_v6 }
  0x7e   :  { %2584 = vmatmul.mubr.f32.vlgmr.msra.gmra.mrb[0].mxu1 %v205_v21  ;;  %2689 = vmatmul.mubr.f32.vlgmr.msra.gmra.mrb[0].mxu0 %v203_v61  ;;  %v278_v61 = vsub.f32 %v4225_v20, %v277_v28  ;;  %v307_v21 = vand.u32 4294901760, %v306_v16  ;;  %v3337_v28 = vpack.c.bf16 %v319_v50, %v312_v43 }
  0x7f   :  { %3216 = vmatpush3.bf16.msra.mxu1 %v3213_v15  ;;  %3312 = vmatpush3.bf16.msra.mxu0 %v3309_v6 }
  0x80   :  { %3218 = vmatprep.subr.bf16.mxu1 %v3217_v27  ;;  %3314 = vmatprep.subr.bf16.mxu0 %v3313_v24  ;;  %v279_v6 = vand.u32 4294901760, %v278_v61  ;;  %v3237_v32 = vpack.c.bf16 %v307_v21, %v300_v19 }
  0x81   :  { %2618 = vmatprep.mubr.f32.mxu1 %v4072_v17  ;;  %2723 = vmatprep.mubr.f32.mxu0 %v4072_v17 }
  0x82   :  { %v3229_v15 = vpack.c.bf16 %v279_v6, %v272_v41  ;;  %v853_v6 = vand.u32 4294901760, %v808_v4 }
  0x83   :  { %3220 = vmatpush3.bf16.msra.mxu1 %v3217_v27  ;;  %3316 = vmatpush3.bf16.msra.mxu0 %v3313_v24  ;;  %v313_v24 = vsub.f32 %v4266_v42, %v312_v43 }
  0x84   :  { %3222 = vmatprep.subr.bf16.mxu1 %v3221_v62  ;;  %3318 = vmatprep.subr.bf16.mxu0 %v3317_v31 }
  0x85   :  { %v314_v27 = vand.u32 4294901760, %v313_v24 }
  0x87   :  { %3224 = vmatpush3.bf16.msra.mxu1 %v3221_v62  ;;  %3320 = vmatpush3.bf16.msra.mxu0 %v3317_v31  ;;  %v3241_v48 = vpack.c.bf16 %v321_v47, %v314_v27  ;;  %v3245_v31 = vpack.c.bf16 %v4127_v39, %v4125_v38  ;;  %v3253_v38 = vpack.c.bf16 %v4181_v59, %v4171_v55  ;;  %v4314_v55 = vld [vmem:[#allocation8 + $0x18] sm:$0xff]  ;;  %v844_v62 = vand.u32 4294901760, %v805_v57 }
  0x88   :  { %3226 = vmatprep.subr.bf16.mxu1 %v3225_v2  ;;  %3322 = vmatprep.subr.bf16.mxu0 %v3321_v36  ;;  %v3257_v39 = vpack.c.bf16 %v4202_v1, %v4197_v0  ;;  %v826_v0 = vand.u32 4294901760, %v4314_v55  ;;  %v4322_v1 = vld [vmem:[#allocation8 + $0x20] sm:$0xff] }
  0x8b   :  { %3228 = vmatpush3.bf16.msra.mxu1 %v3225_v2  ;;  %3324 = vmatpush3.bf16.msra.mxu0 %v3321_v36  ;;  %v807_v36 = vld [vmem:[#allocation8 + $0x58] sm:$0xff] }
  0x8c   :  { %3230 = vmatprep.subr.bf16.mxu1 %v3229_v15  ;;  %3326 = vmatprep.subr.bf16.mxu0 %v3325_v9  ;;  %v850_v2 = vand.u32 4294901760, %v807_v36 }
  0x8f   :  { %3232 = vmatpush3.bf16.msra.mxu1 %v3229_v15  ;;  %3328 = vmatpush3.bf16.msra.mxu0 %v3325_v9  ;;  %v862_v15 = vand.u32 4294901760, %v811_v12 }
  0x90   :  { %3234 = vmatprep.subr.bf16.mxu1 %v3233_v44  ;;  %3330 = vmatprep.subr.bf16.mxu0 %v3329_v51 }
  0x91   :  { %v4381_v50 = vpack.c.bf16 %v862_v15, %v859_v14 }
  0x93   :  { %3236 = vmatpush3.bf16.msra.mxu1 %v3233_v44  ;;  %3332 = vmatpush3.bf16.msra.mxu0 %v3329_v51 }
  0x94   :  { %3238 = vmatprep.subr.bf16.mxu1 %v3237_v32  ;;  %3334 = vmatprep.subr.bf16.mxu0 %v3333_v33 }
  0x97   :  { %3240 = vmatpush3.bf16.msra.mxu1 %v3237_v32  ;;  %3336 = vmatpush3.bf16.msra.mxu0 %v3333_v33  ;;  %v4396_v32 = vsub.f32 %v805_v57, %v844_v62 }
  0x98   :  { %3242 = vmatprep.subr.bf16.mxu1 %v3241_v48  ;;  %3338 = vmatprep.subr.bf16.mxu0 %v3337_v28 }
  0x99   :  { %v5018_v27 = vand.u32 4294901760, %v4396_v32 }
  0x9b   :  { %3244 = vmatpush3.bf16.msra.mxu1 %v3241_v48  ;;  %3340 = vmatpush3.bf16.msra.mxu0 %v3337_v28  ;;  %v984_v48 = vsub.f32 %v4396_v32, %v5018_v27 }
  0x9c   :  { %3246 = vmatprep.subr.bf16.mxu1 %v3245_v31  ;;  %3342 = vmatprep.subr.bf16.mxu0 %v4058_v10 }
  0x9e   :  { %2619 = vmatmul.mubr.f32.vlgmr.msra.gmra.mrb[0].mxu1 %v4129_v40  ;;  %2724 = vmatmul.mubr.f32.vlgmr.msra.gmra.mrb[0].mxu0 %v4129_v40 }
  0x9f   :  { %3248 = vmatpush3.bf16.msra.mxu1 %v3245_v31  ;;  %3344 = vmatpush3.bf16.msra.mxu0 %v4058_v10  ;;  %v3261_v10 = vpack.c.bf16 %v4225_v20, %v4212_v8  ;;  %v4324_v8 = vld [vmem:[#allocation8 + $0x28] sm:$0xff]  ;;  %v829_v20 = vand.u32 4294901760, %v4322_v1  ;;  %v4408_v31 = vsub.f32 %v807_v36, %v850_v2  ;;  %v4433_v36 = vsub.f32 %v811_v12, %v862_v15 }
  0xa0   :  { %3250 = vmatprep.subr.bf16.mxu1 %v3249_v54  ;;  %3346 = vmatprep.subr.bf16.mxu0 %v4062_v13 }
  0xa1   :  { %2653 = vmatprep.mubr.f32.mxu1 %v4089_v23  ;;  %2758 = vmatprep.mubr.f32.mxu0 %v4072_v17  ;;  %v3269_v17 = vpack.c.bf16 %v4255_v63, %v4247_v56  ;;  %v797_v23 = vld [vmem:[#allocation8 + $0x8] sm:$0xff]  ;;  %v4338_v56 = vld [vmem:[#allocation8 + $0x38] sm:$0xff]  ;;  %v806_v63 = vld [vmem:[#allocation8 + $0x50] sm:$0xff] }
  0xa2   :  { %v820_v49 = vand.u32 4294901760, %v797_v23  ;;  %v838_v35 = vand.u32 4294901760, %v4338_v56  ;;  %v847_v41 = vand.u32 4294901760, %v806_v63 }
  0xa3   :  { %3252 = vmatpush3.bf16.msra.mxu1 %v3249_v54  ;;  %3348 = vmatpush3.bf16.msra.mxu0 %v4062_v13  ;;  %v3265_v13 = vpack.c.bf16 %v4240_v22, %v4231_v30  ;;  %v832_v30 = vand.u32 4294901760, %v4324_v8  ;;  %v4336_v22 = vld [vmem:[#allocation8 + $0x30] sm:$0xff] }
  0xa4   :  { %3254 = vmatprep.subr.bf16.mxu1 %v3253_v38  ;;  %3350 = vmatprep.subr.bf16.mxu0 %v4080_v18  ;;  %v835_v29 = vand.u32 4294901760, %v4336_v22  ;;  %v4367_v3 = vpack.c.bf16 %v850_v2, %v847_v41  ;;  %v4375_v9 = vsub.f32 %v797_v23, %v820_v49  ;;  %v4406_v28 = vsub.f32 %v806_v63, %v847_v41 }
  0xa5   :  { %v4420_v23 = vsub.f32 %v808_v4, %v853_v6  ;;  %v4431_v63 = vsub.f32 %v810_v11, %v859_v14 }
  0xa6   :  { %v927_v43 = vand.u32 4294901760, %v4375_v9 }
  0xa7   :  { %3256 = vmatpush3.bf16.msra.mxu1 %v3253_v38  ;;  %3352 = vmatpush3.bf16.msra.mxu0 %v4080_v18  ;;  %v796_v18 = vld [vmem:[#allocation8] sm:$0xff]  ;;  %v985_v38 = vand.u32 4294901760, %v984_v48  ;;  %v5013_v4 = vand.u32 4294901760, %v4431_v63  ;;  %v4468_v48 = vpack.c.bf16 %v4433_v36, %v4431_v63 }
  0xa8   :  { %3258 = vmatprep.subr.bf16.mxu1 %v3257_v39  ;;  %3354 = vmatprep.subr.bf16.mxu0 %v4100_v25  ;;  %v817_v45 = vand.u32 4294901760, %v796_v18  ;;  %v928_v51 = vsub.f32 %v4375_v9, %v927_v43 }
  0xaa   :  { %v4318_v59 = vpack.c.bf16 %v820_v49, %v817_v45  ;;  %v929_v21 = vand.u32 4294901760, %v928_v51 }
  0xab   :  { %3260 = vmatpush3.bf16.msra.mxu1 %v3257_v39  ;;  %3356 = vmatpush3.bf16.msra.mxu0 %v4100_v25  ;;  %v3273_v25 = vpack.c.bf16 %v4271_v7, %v4266_v42  ;;  %v4371_v42 = vpack.c.bf16 %v856_v37, %v853_v6  ;;  %v4373_v7 = vsub.f32 %v796_v18, %v817_v45  ;;  %v5017_v39 = vand.u32 4294901760, %v4406_v28 }
  0xac   :  { %3262 = vmatprep.subr.bf16.mxu1 %v3261_v10  ;;  %3358 = vmatprep.subr.bf16.mxu0 %v4118_v34 }
  0xad   :  { %v920_v16 = vand.u32 4294901760, %v4373_v7  ;;  %v4452_v51 = vpack.c.bf16 %v4375_v9, %v4373_v7 }
  0xaf   :  { %3264 = vmatpush3.bf16.msra.mxu1 %v3261_v10  ;;  %3360 = vmatpush3.bf16.msra.mxu0 %v4118_v34  ;;  %v4312_v34 = vld [vmem:[#allocation8 + $0x10] sm:$0xff]  ;;  %v921_v44 = vsub.f32 %v4373_v7, %v920_v16  ;;  %v5016_v10 = vand.u32 4294901760, %v4408_v31 }
  0xb0   :  { %3266 = vmatprep.subr.bf16.mxu1 %v3265_v13  ;;  %3362 = vmatprep.subr.bf16.mxu0 %v4147_v46 }
  0xb1   :  { %v922_v19 = vand.u32 4294901760, %v921_v44  ;;  %v998_v18 = vsub.f32 %v4408_v31, %v5016_v10 }
  0xb3   :  { %3268 = vmatpush3.bf16.msra.mxu1 %v3265_v13  ;;  %3364 = vmatpush3.bf16.msra.mxu0 %v4147_v46  ;;  %v823_v46 = vand.u32 4294901760, %v4312_v34  ;;  %v4391_v24 = vpack.c.bf16 %v929_v21, %v922_v19  ;;  %v999_v49 = vand.u32 4294901760, %v998_v18  ;;  %v4460_v21 = vpack.c.bf16 %v4408_v31, %v4406_v28  ;;  %v4473_v18 = vld [vmem:[#allocation5] sm:$0x7] }
  0xb4   :  { %3270 = vmatprep.subr.bf16.mxu1 %v3269_v17  ;;  %3366 = vmatprep.subr.bf16.mxu0 %v4165_v53 }
  0xb7   :  { %3272 = vmatpush3.bf16.msra.mxu1 %v3269_v17  ;;  %3368 = vmatpush3.bf16.msra.mxu0 %v4165_v53  ;;  %v4332_v53 = vpack.c.bf16 %v826_v0, %v823_v46  ;;  %v991_v17 = vsub.f32 %v4406_v28, %v5017_v39 }
  0xb8   :  { %3274 = vmatprep.subr.bf16.mxu1 %v3273_v25  ;;  %3370 = vmatprep.subr.bf16.mxu0 %v4187_v60 }
  0xb9   :  { %v992_v45 = vand.u32 4294901760, %v991_v17 }
  0xbb   :  { %3276 = vmatpush3.bf16.msra.mxu1 %v3273_v25  ;;  %3372 = vmatpush3.bf16.msra.mxu0 %v4187_v60  ;;  %v4348_v60 = vpack.c.bf16 %v832_v30, %v829_v20  ;;  %v4422_v25 = vsub.f32 %v809_v5, %v856_v37  ;;  %v5012_v5 = vand.u32 4294901760, %v4433_v36  ;;  %v1019_v37 = vsub.f32 %v4431_v63, %v5013_v4 }
  0xbc   :  { %3374 = vmatprep.subr.bf16.mxu1 %v4318_v59 }
  0xbd   :  { %v5014_v57 = vand.u32 4294901760, %v4422_v25  ;;  %v1026_v11 = vsub.f32 %v4433_v36, %v5012_v5  ;;  %v1020_v14 = vand.u32 4294901760, %v1019_v37 }
  0xbe   :  { %2654 = vmatmul.mubr.f32.vlgmr.msra.gmra.mrb[0].mxu1 %v4157_v52  ;;  %2759 = vmatmul.mubr.f32.vlgmr.msra.gmra.mrb[0].mxu0 %v4129_v40  ;;  %v4358_v40 = vpack.c.bf16 %v838_v35, %v835_v29  ;;  %v804_v52 = vld [vmem:[#allocation8 + $0x40] sm:$0xff] }
  0xbf   :  { %3376 = vmatpush3.bf16.msra.mxu1 %v4318_v59  ;;  %v841_v58 = vand.u32 4294901760, %v804_v52  ;;  %v1012_v41 = vsub.f32 %v4422_v25, %v5014_v57  ;;  %v1027_v15 = vand.u32 4294901760, %v1026_v11 }
  0xc0   :  { %3378 = vmatprep.subr.bf16.mxu1 %v4332_v53 }
  0xc1   :  { %v4363_v61 = vpack.c.bf16 %v844_v62, %v841_v58  ;;  %v4394_v26 = vsub.f32 %v804_v52, %v841_v58  ;;  %v5015_v52 = vand.u32 4294901760, %v4420_v23  ;;  %v4426_v58 = vpack.c.bf16 %v999_v49, %v992_v45 }
  0xc2   :  { %v1013_v6 = vand.u32 4294901760, %v1012_v41  ;;  %v4448_v44 = vpack.c.bf16 %v1027_v15, %v1020_v14  ;;  %v4479_v41 = vsub.f32 %v4312_v34, %v823_v46  ;;  %v4491_v34 = vsub.f32 %v4322_v1, %v829_v20 }
  0xc3   :  { %3380 = vmatpush3.bf16.msra.mxu1 %v4332_v53  ;;  %v976_v33 = vand.u32 4294901760, %v4394_v26  ;;  %v1005_v62 = vsub.f32 %v4420_v23, %v5015_v52  ;;  %v4456_v19 = vpack.c.bf16 %v4396_v32, %v4394_v26 }
  0xc4   :  { %3382 = vmatprep.subr.bf16.mxu1 %v4348_v60  ;;  %v948_v20 = vand.u32 4294901760, %v4491_v34 }
  0xc5   :  { %v977_v47 = vsub.f32 %v4394_v26, %v976_v33  ;;  %v1006_v2 = vand.u32 4294901760, %v1005_v62  ;;  %v5034_v26 = vand.u32 4294901760, %v4431_v63 }
  0xc6   :  { %v949_v4 = vsub.f32 %v4491_v34, %v948_v20 }
  0xc7   :  { %3384 = vmatpush3.bf16.msra.mxu1 %v4348_v60  ;;  %v978_v54 = vand.u32 4294901760, %v977_v47  ;;  %v4446_v12 = vpack.c.bf16 %v1013_v6, %v1006_v2  ;;  %v4464_v47 = vpack.c.bf16 %v4422_v25, %v4420_v23  ;;  %v4484_v2 = vsub.f32 %v4314_v55, %v826_v0 }
  0xc8   :  { %3386 = vmatprep.subr.bf16.mxu1 %v4358_v40  ;;  %v4496_v55 = vsub.f32 %v4324_v8, %v832_v30  ;;  %v4516_v30 = vsub.f32 %v4336_v22, %v835_v29  ;;  %v950_v57 = vand.u32 4294901760, %v949_v4 }
  0xc9   :  { %v4412_v13 = vpack.c.bf16 %v985_v38, %v978_v54  ;;  %v106_v54 = vlaneseq  ;;  %v941_v5 = vand.u32 4294901760, %v4484_v2 }
  0xca   :  { %v955_v8 = vand.u32 4294901760, %v4496_v55  ;;  %v962_v29 = vand.u32 4294901760, %v4516_v30 }
  0xcb   :  { %3388 = vmatpush3.bf16.msra.mxu1 %v4358_v40  ;;  %v4470_v38 = vshrl.u32 %v106_v54, 7  ;;  %v942_v1 = vsub.f32 %v4484_v2, %v941_v5 }
  0xcc   :  { %3390 = vmatprep.subr.bf16.mxu1 %v4363_v61  ;;  %v963_v39 = vsub.f32 %v4516_v30, %v962_v29  ;;  %v3509_v7 = vpack.c.bf16 %v955_v8, %v948_v20  ;;  %v1516_v20 = vld [vmem:[#allocation10 + $0x70] sm:$0xff] }
  0xcd   :  { %v108_v17 = vsub.s32 0, %v4470_v38 }
  0xcf   :  { %3392 = vmatpush3.bf16.msra.mxu1 %v4363_v61  ;;  %v109_v45 = vrot.slane %v4473_v18, %v108_v17  ;;  %v934_v17 = vand.u32 4294901760, %v4479_v41 }
  0xd0   :  { %3394 = vmatprep.subr.bf16.mxu1 %v4367_v3 }
  0xd3   :  { %3396 = vmatpush3.bf16.msra.mxu1 %v4367_v3 }
  0xd4   :  { %3398 = vmatprep.subr.bf16.mxu1 %v4371_v42 }
  0xd7   :  { %3400 = vmatpush3.bf16.msra.mxu1 %v4371_v42 }
  0xd8   :  { %3402 = vmatprep.subr.bf16.mxu1 %v4381_v50 }
  0xdb   :  { %3404 = vmatpush3.bf16.msra.mxu1 %v4381_v50 }
  0xdc   :  { %3406 = vmatprep.subr.bf16.mxu1 %v4391_v24 }
 0x191   :  { %v2655_v49 = vpop.f32.mrb[0].mxu1  ;;  %v2760_v62 = vpop.f32.mrb[0].mxu0 }
 0x192   :  { %v3757_v6 = vadd.f32 %v2655_v49, %v109_v45  ;;  %v468_v37 = vpop.f32.mrb[1].mxu1  ;;  %v784_v11 = vpop.f32.mrb[1].mxu0 }
 0x193   :  { %v3759_v14 = vadd.f32 %v468_v37, %v109_v45  ;;  %v4521_v37 = vsub.f32 %v4338_v56, %v838_v35  ;;  %v956_v56 = vsub.f32 %v4496_v55, %v955_v8  ;;  %v1565_v8 = vand.u32 4294901760, %v1516_v20 }
 0x194   :  { %v3758_v15 = vadd.f32 %v3757_v6, %v2760_v62  ;;  %v935_v62 = vsub.f32 %v4479_v41, %v934_v17 }
 0x195   :  { %v3760_v54 = vadd.f32 %v3759_v14, %v784_v11  ;;  %v969_v35 = vand.u32 4294901760, %v4521_v37  ;;  %v957_v10 = vand.u32 4294901760, %v956_v56 }
 0x196   :  { %v795_v46 = vmax.f32 %v3758_v15, 0.0 }
 0x197   :  { %v794_v0 = vmax.f32 %v3760_v54, 0.0  ;;  %v936_v54 = vand.u32 4294901760, %v935_v62  ;;  %v970_v27 = vsub.f32 %v4521_v37, %v969_v35  ;;  %v3513_v9 = vpack.c.bf16 %v969_v35, %v962_v29 }
 0x198   :  { %v4498_v49 = vand.u32 4294901760, %v795_v46 }
 0x199   :  { %v4500_v45 = vand.u32 4294901760, %v794_v0  ;;  %v971_v4 = vand.u32 4294901760, %v970_v27  ;;  %v4562_v27 = vld [vmem:[#allocation10] sm:$0xff] }
 0x19a   :  { %v4510_v6 = vsub.f32 %v795_v46, %v4498_v49  ;;  %v943_v46 = vand.u32 4294901760, %v942_v1 }
 0x19b   :  { %v4524_v11 = vsub.f32 %v794_v0, %v4500_v45 }
 0x19c   :  { %v909_v14 = vand.u32 4294901760, %v4510_v6  ;;  %v3409_v1 = vpack.c.bf16 %v943_v46, %v936_v54  ;;  %v964_v54 = vand.u32 4294901760, %v963_v39  ;;  %v4564_v39 = vld [vmem:[#allocation10 + $0x8] sm:$0xff] }
 0x19d   :  { %v899_v15 = vand.u32 4294901760, %v4524_v11 }
 0x19e   :  { %v910_v22 = vsub.f32 %v4510_v6, %v909_v14  ;;  %v3417_v46 = vpack.c.bf16 %v971_v4, %v964_v54  ;;  %v4596_v54 = vld [vmem:[#allocation10 + $0x30] sm:$0xff]  ;;  %v4598_v4 = vld [vmem:[#allocation10 + $0x38] sm:$0xff] }
 0x19f   :  { %v900_v0 = vsub.f32 %v4524_v11, %v899_v15 }
 0x1a0   :  { %v911_v52 = vand.u32 4294901760, %v910_v22  ;;  %v3445_v22 = vpack.c.bf16 %v4496_v55, %v4491_v34 }
 0x1a1   :  { %v901_v62 = vand.u32 4294901760, %v900_v0  ;;  %v3413_v0 = vpack.c.bf16 %v957_v10, %v950_v57  ;;  %v4566_v10 = vld [vmem:[#allocation10 + $0x10] sm:$0xff]  ;;  %v4572_v57 = vld [vmem:[#allocation10 + $0x18] sm:$0xff] }
 0x1a3   :  { %2793 = vmatprep.mubr.f32.mxu1 %v901_v62 }
 0x1a4   :  { %2794 = vmatmul.mubr.f32.vlgmr.msra.gmra.mrb[2].mxu1 %v911_v52  ;;  %v5021_v52 = vand.u32 4294901760, %v4564_v39 }
 0x1a5   :  { %3408 = vmatpush3.bf16.msra.mxu1 %v4391_v24  ;;  %2828 = vmatprep.mubr.f32.mxu1 %v4500_v45  ;;  %v3441_v24 = vpack.c.bf16 %v4484_v2, %v4479_v41  ;;  %v5032_v41 = vand.u32 4294901760, %v4420_v23  ;;  %v5033_v2 = vand.u32 4294901760, %v4422_v25  ;;  %v1514_v25 = vld [vmem:[#allocation10 + $0x60] sm:$0xff] }
 0x1a6   :  { %3410 = vmatprep.subr.bf16.mxu1 %v3409_v1  ;;  %v1559_v63 = vand.u32 4294901760, %v1514_v25 }
 0x1a9   :  { %3412 = vmatpush3.bf16.msra.mxu1 %v3409_v1 }
 0x1aa   :  { %3414 = vmatprep.subr.bf16.mxu1 %v3413_v0 }
 0x1ad   :  { %3416 = vmatpush3.bf16.msra.mxu1 %v3413_v0 }
 0x1ae   :  { %3418 = vmatprep.subr.bf16.mxu1 %v3417_v46 }
 0x1b1   :  { %3420 = vmatpush3.bf16.msra.mxu1 %v3417_v46  ;;  %v3449_v46 = vpack.c.bf16 %v4521_v37, %v4516_v30 }
 0x1b2   :  { %3422 = vmatprep.subr.bf16.mxu1 %v4412_v13 }
 0x1b5   :  { %3424 = vmatpush3.bf16.msra.mxu1 %v4412_v13  ;;  %v1523_v13 = vand.u32 4294901760, %v4562_v27 }
 0x1b6   :  { %3426 = vmatprep.subr.bf16.mxu1 %v4426_v58 }
 0x1b7   :  { %v4586_v56 = vpack.c.bf16 %v5021_v52, %v1523_v13  ;;  %v4718_v55 = vsub.f32 %v4562_v27, %v1523_v13 }
 0x1b9   :  { %3428 = vmatpush3.bf16.msra.mxu1 %v4426_v58  ;;  %v5020_v58 = vand.u32 4294901760, %v4566_v10  ;;  %3566 = vmatprep.subr.bf16.mxu0 %v4586_v56  ;;  %v1626_v37 = vand.u32 4294901760, %v4718_v55 }
 0x1ba   :  { %3430 = vmatprep.subr.bf16.mxu1 %v4446_v12  ;;  %3568 = vmatpush3.bf16.msra.mxu0 %v4586_v56 }
 0x1bd   :  { %3432 = vmatpush3.bf16.msra.mxu1 %v4446_v12  ;;  %v4575_v12 = vld [vmem:[#allocation10 + $0x20] sm:$0xff] }
 0x1be   :  { %3434 = vmatprep.subr.bf16.mxu1 %v4448_v44  ;;  %v1535_v62 = vand.u32 4294901760, %v4575_v12 }
 0x1c1   :  { %3436 = vmatpush3.bf16.msra.mxu1 %v4448_v44  ;;  %v4577_v44 = vld [vmem:[#allocation10 + $0x28] sm:$0xff] }
 0x1c2   :  { %3438 = vmatprep.subr.bf16.mxu1 %v4452_v51  ;;  %v1538_v1 = vand.u32 4294901760, %v4577_v44 }
 0x1c4   :  { %2829 = vmatmul.mubr.f32.vlgmr.msra.gmra.mrb[2].mxu1 %v4498_v49 }
 0x1c5   :  { %3440 = vmatpush3.bf16.msra.mxu1 %v4452_v51  ;;  %2863 = vmatprep.mubr.f32.mxu1 %v4524_v11  ;;  %v5019_v51 = vand.u32 4294901760, %v4572_v57 }
 0x1c6   :  { %3442 = vmatprep.subr.bf16.mxu1 %v3441_v24 }
 0x1c7   :  { %v4594_v0 = vpack.c.bf16 %v5019_v51, %v5020_v58  ;;  %v4609_v51 = vpack.c.bf16 %v1538_v1, %v1535_v62  ;;  %v1541_v58 = vand.u32 4294901760, %v4596_v54 }
 0x1c9   :  { %3444 = vmatpush3.bf16.msra.mxu1 %v3441_v24  ;;  %3570 = vmatprep.subr.bf16.mxu0 %v4594_v0  ;;  %v1544_v24 = vand.u32 4294901760, %v4598_v4 }
 0x1ca   :  { %3446 = vmatprep.subr.bf16.mxu1 %v3445_v22  ;;  %3572 = vmatpush3.bf16.msra.mxu0 %v4594_v0 }
 0x1cb   :  { %3574 = vmatprep.subr.bf16.mxu0 %v4609_v51  ;;  %v4619_v52 = vpack.c.bf16 %v1544_v24, %v1541_v58 }
 0x1cd   :  { %3448 = vmatpush3.bf16.msra.mxu1 %v3445_v22 }
 0x1ce   :  { %3450 = vmatprep.subr.bf16.mxu1 %v3449_v46  ;;  %3576 = vmatpush3.bf16.msra.mxu0 %v4609_v51 }
 0x1cf   :  { %3578 = vmatprep.subr.bf16.mxu0 %v4619_v52 }
 0x1d1   :  { %3452 = vmatpush3.bf16.msra.mxu1 %v3449_v46 }
 0x1d2   :  { %3454 = vmatprep.subr.bf16.mxu1 %v4456_v19  ;;  %3580 = vmatpush3.bf16.msra.mxu0 %v4619_v52 }
 0x1d5   :  { %3456 = vmatpush3.bf16.msra.mxu1 %v4456_v19  ;;  %v3501_v19 = vpack.c.bf16 %v927_v43, %v920_v16  ;;  %v5029_v16 = vand.u32 4294901760, %v4396_v32  ;;  %v5035_v32 = vand.u32 4294901760, %v4433_v36 }
 0x1d6   :  { %3458 = vmatprep.subr.bf16.mxu1 %v4460_v21 }
 0x1d7   :  { %v3517_v43 = vpack.c.bf16 %v5029_v16, %v976_v33  ;;  %v3529_v33 = vpack.c.bf16 %v5035_v32, %v5034_v26  ;;  %v4768_v26 = vsub.f32 %v1514_v25, %v1559_v63 }
 0x1d9   :  { %3460 = vmatpush3.bf16.msra.mxu1 %v4460_v21  ;;  %v3505_v21 = vpack.c.bf16 %v941_v5, %v934_v17  ;;  %v5030_v5 = vand.u32 4294901760, %v4406_v28  ;;  %v3525_v17 = vpack.c.bf16 %v5033_v2, %v5032_v41 }
 0x1da   :  { %3462 = vmatprep.subr.bf16.mxu1 %v4464_v47 }
 0x1dd   :  { %3464 = vmatpush3.bf16.msra.mxu1 %v4464_v47  ;;  %v5031_v47 = vand.u32 4294901760, %v4408_v31  ;;  %v1513_v31 = vld [vmem:[#allocation10 + $0x58] sm:$0xff] }
 0x1de   :  { %3466 = vmatprep.subr.bf16.mxu1 %v4468_v48  ;;  %v1556_v23 = vand.u32 4294901760, %v1513_v31 }
 0x1e0   :  { %v4756_v16 = vsub.f32 %v1513_v31, %v1556_v23  ;;  %v4779_v31 = vsub.f32 %v1516_v20, %v1565_v8 }
 0x1e1   :  { %3468 = vmatpush3.bf16.msra.mxu1 %v4468_v48  ;;  %v3521_v48 = vpack.c.bf16 %v5031_v47, %v5030_v5 }
 0x1e2   :  { %3470 = vmatprep.subr.bf16.mxu1 %v4318_v59 }
 0x1e4   :  { %2864 = vmatmul.mubr.f32.vlgmr.msra.gmra.mrb[2].mxu1 %v4510_v6  ;;  %v1517_v6 = vld [vmem:[#allocation10 + $0x78] sm:$0xff] }
 0x1e5   :  { %3472 = vmatpush3.bf16.msra.mxu1 %v4318_v59  ;;  %2898 = vmatprep.mubr.f32.mxu1 %v899_v15  ;;  %v1568_v30 = vand.u32 4294901760, %v1517_v6  ;;  %v1627_v15 = vsub.f32 %v4718_v55, %v1626_v37 }
 0x1e6   :  { %3474 = vmatprep.subr.bf16.mxu1 %v4332_v53 }
 0x1e7   :  { %v1628_v35 = vand.u32 4294901760, %v1627_v15 }
 0x1e9   :  { %3476 = vmatpush3.bf16.msra.mxu1 %v4332_v53 }
 0x1ea   :  { %3478 = vmatprep.subr.bf16.mxu1 %v4348_v60 }
 0x1ed   :  { %3480 = vmatpush3.bf16.msra.mxu1 %v4348_v60 }
 0x1ee   :  { %3482 = vmatprep.subr.bf16.mxu1 %v4358_v40 }
 0x1f1   :  { %3484 = vmatpush3.bf16.msra.mxu1 %v4358_v40 }
 0x1f2   :  { %3486 = vmatprep.subr.bf16.mxu1 %v4363_v61 }
 0x1f5   :  { %3488 = vmatpush3.bf16.msra.mxu1 %v4363_v61 }
 0x1f6   :  { %3490 = vmatprep.subr.bf16.mxu1 %v4367_v3 }
 0x1f9   :  { %3492 = vmatpush3.bf16.msra.mxu1 %v4367_v3 }
 0x1fa   :  { %3494 = vmatprep.subr.bf16.mxu1 %v4371_v42 }
 0x1fd   :  { %3496 = vmatpush3.bf16.msra.mxu1 %v4371_v42 }
 0x1fe   :  { %3498 = vmatprep.subr.bf16.mxu1 %v4381_v50 }
 0x201   :  { %3500 = vmatpush3.bf16.msra.mxu1 %v4381_v50 }
 0x202   :  { %3502 = vmatprep.subr.bf16.mxu1 %v3501_v19 }
 0x204   :  { %2899 = vmatmul.mubr.f32.vlgmr.msra.gmra.mrb[2].mxu1 %v909_v14  ;;  %v4729_v14 = vpack.c.bf16 %v1568_v30, %v1565_v8 }
 0x205   :  { %3504 = vmatpush3.bf16.msra.mxu1 %v3501_v19  ;;  %2933 = vmatprep.mubr.f32.mxu1 %v4500_v45 }
 0x206   :  { %3506 = vmatprep.subr.bf16.mxu1 %v3505_v21 }
 0x209   :  { %3508 = vmatpush3.bf16.msra.mxu1 %v3505_v21 }
 0x20a   :  { %3510 = vmatprep.subr.bf16.mxu1 %v3509_v7 }
 0x20d   :  { %3512 = vmatpush3.bf16.msra.mxu1 %v3509_v7 }
 0x20e   :  { %3514 = vmatprep.subr.bf16.mxu1 %v3513_v9 }
 0x211   :  { %3516 = vmatpush3.bf16.msra.mxu1 %v3513_v9 }
 0x212   :  { %3518 = vmatprep.subr.bf16.mxu1 %v3517_v43 }
 0x215   :  { %3520 = vmatpush3.bf16.msra.mxu1 %v3517_v43 }
 0x216   :  { %3522 = vmatprep.subr.bf16.mxu1 %v3521_v48 }
 0x219   :  { %3524 = vmatpush3.bf16.msra.mxu1 %v3521_v48  ;;  %v5026_v48 = vand.u32 4294901760, %v4756_v16 }
 0x21a   :  { %3526 = vmatprep.subr.bf16.mxu1 %v3525_v17 }
 0x21d   :  { %3528 = vmatpush3.bf16.msra.mxu1 %v3525_v17  ;;  %v1704_v17 = vsub.f32 %v4756_v16, %v5026_v48 }
 0x21e   :  { %3530 = vmatprep.subr.bf16.mxu1 %v3529_v33 }
 0x221   :  { %3532 = vmatpush3.bf16.msra.mxu1 %v3529_v33 }
 0x222   :  { %3534 = vmatprep.subr.bf16.mxu1 %v4318_v59 }
 0x224   :  { %2934 = vmatmul.mubr.f32.vlgmr.msra.gmra.mrb[2].mxu1 %v4498_v49 }
 0x225   :  { %3536 = vmatpush3.bf16.msra.mxu1 %v4318_v59  ;;  %2968 = vmatprep.mubr.f32.mxu1 %v4500_v45  ;;  %v1510_v59 = vld [vmem:[#allocation10 + $0x40] sm:$0xff] }
 0x226   :  { %3538 = vmatprep.subr.bf16.mxu1 %v4332_v53 }
 0x229   :  { %3540 = vmatpush3.bf16.msra.mxu1 %v4332_v53  ;;  %v1511_v53 = vld [vmem:[#allocation10 + $0x48] sm:$0xff] }
 0x22a   :  { %3542 = vmatprep.subr.bf16.mxu1 %v4348_v60 }
 0x22d   :  { %3544 = vmatpush3.bf16.msra.mxu1 %v4348_v60  ;;  %v1547_v60 = vand.u32 4294901760, %v1510_v59 }
 0x22e   :  { %3546 = vmatprep.subr.bf16.mxu1 %v4358_v40 }
 0x22f   :  { %v4742_v13 = vsub.f32 %v1510_v59, %v1547_v60  ;;  %v1705_v59 = vand.u32 4294901760, %v1704_v17 }
 0x231   :  { %3548 = vmatpush3.bf16.msra.mxu1 %v4358_v40  ;;  %v1550_v40 = vand.u32 4294901760, %v1511_v53  ;;  %v1682_v46 = vand.u32 4294901760, %v4742_v13 }
 0x232   :  { %3550 = vmatprep.subr.bf16.mxu1 %v4363_v61 }
 0x233   :  { %v4705_v28 = vpack.c.bf16 %v1550_v40, %v1547_v60  ;;  %v4744_v22 = vsub.f32 %v1511_v53, %v1550_v40  ;;  %v1683_v21 = vsub.f32 %v4742_v13, %v1682_v46  ;;  %v5025_v53 = vand.u32 4294901760, %v4768_v26 }
 0x235   :  { %3552 = vmatpush3.bf16.msra.mxu1 %v4363_v61  ;;  %v1512_v61 = vld [vmem:[#allocation10 + $0x50] sm:$0xff]  ;;  %3582 = vmatprep.subr.bf16.mxu0 %v4705_v28  ;;  %v5028_v19 = vand.u32 4294901760, %v4744_v22  ;;  %v1684_v43 = vand.u32 4294901760, %v1683_v21 }
 0x236   :  { %3554 = vmatprep.subr.bf16.mxu1 %v4367_v3  ;;  %3584 = vmatpush3.bf16.msra.mxu0 %v4705_v28 }
 0x237   :  { %v1690_v7 = vsub.f32 %v4744_v22, %v5028_v19 }
 0x239   :  { %3556 = vmatpush3.bf16.msra.mxu1 %v4367_v3  ;;  %v1553_v3 = vand.u32 4294901760, %v1512_v61  ;;  %v1691_v5 = vand.u32 4294901760, %v1690_v7 }
 0x23a   :  { %3558 = vmatprep.subr.bf16.mxu1 %v4371_v42 }
 0x23b   :  { %v4754_v9 = vsub.f32 %v1512_v61, %v1553_v3  ;;  %v4760_v41 = vpack.c.bf16 %v1691_v5, %v1684_v43  ;;  %v1711_v61 = vsub.f32 %v4768_v26, %v5025_v53  ;;  %v814_v43 = vsub.s32 1, %v4470_v38 }
 0x23d   :  { %3560 = vmatpush3.bf16.msra.mxu1 %v4371_v42  ;;  %v4709_v42 = vpack.c.bf16 %v1556_v23, %v1553_v3  ;;  %v5027_v47 = vand.u32 4294901760, %v4754_v9  ;;  %v4781_v3 = vsub.f32 %v1517_v6, %v1568_v30  ;;  %v1712_v25 = vand.u32 4294901760, %v1711_v61 }
 0x23e   :  { %3562 = vmatprep.subr.bf16.mxu1 %v4381_v50  ;;  %v815_v5 = vrot.slane %v4473_v18, %v814_v43 }
 0x23f   :  { %3586 = vmatprep.subr.bf16.mxu0 %v4709_v42  ;;  %v1697_v2 = vsub.f32 %v4754_v9, %v5027_v47  ;;  %v4816_v7 = vpack.c.bf16 %v4781_v3, %v4779_v31 }
 0x240   :  { %3588 = vmatpush3.bf16.msra.mxu0 %v4709_v42 }
 0x241   :  { %3564 = vmatpush3.bf16.msra.mxu1 %v4381_v50  ;;  %v1515_v50 = vld [vmem:[#allocation10 + $0x68] sm:$0xff]  ;;  %v1698_v33 = vand.u32 4294901760, %v1697_v2  ;;  %v5037_v2 = vand.u32 4294901760, %v4566_v10 }
 0x242   :  { %v1562_v36 = vand.u32 4294901760, %v1515_v50 }
 0x243   :  { %v4774_v40 = vpack.c.bf16 %v1705_v59, %v1698_v33  ;;  %v4823_v17 = vsub.f32 %v4566_v10, %v5037_v2  ;;  %v5038_v33 = vand.u32 4294901760, %v4572_v57 }
 0x244   :  { %2969 = vmatmul.mubr.f32.vlgmr.msra.gmra.mrb[2].mxu1 %v4498_v49  ;;  %v4713_v34 = vpack.c.bf16 %v1562_v36, %v1559_v63  ;;  %v5036_v49 = vand.u32 4294901760, %v4564_v39  ;;  %v4770_v32 = vsub.f32 %v1515_v50, %v1562_v36  ;;  %v5023_v50 = vand.u32 4294901760, %v4779_v31 }
 0x245   :  { %v5022_v63 = vand.u32 4294901760, %v4781_v3  ;;  %v4828_v59 = vsub.f32 %v4572_v57, %v5038_v33 }
 0x246   :  { %v4723_v45 = vsub.f32 %v4564_v39, %v5036_v49  ;;  %3590 = vmatprep.subr.bf16.mxu0 %v4713_v34  ;;  %v5024_v60 = vand.u32 4294901760, %v4770_v32  ;;  %v1725_v49 = vsub.f32 %v4779_v31, %v5023_v50  ;;  %v4812_v21 = vpack.c.bf16 %v4770_v32, %v4768_v26 }
 0x247   :  { %3592 = vmatpush3.bf16.msra.mxu0 %v4713_v34  ;;  %v1732_v20 = vsub.f32 %v4781_v3, %v5022_v63 }
 0x248   :  { %v1633_v11 = vand.u32 4294901760, %v4723_v45  ;;  %3594 = vmatprep.subr.bf16.mxu0 %v4729_v14  ;;  %v1718_v23 = vsub.f32 %v4770_v32, %v5024_v60  ;;  %v1726_v8 = vand.u32 4294901760, %v1725_v49  ;;  %v1640_v49 = vand.u32 4294901760, %v4823_v17 }
 0x249   :  { %v1733_v30 = vand.u32 4294901760, %v1732_v20  ;;  %v1647_v20 = vand.u32 4294901760, %v4828_v59 }
 0x24a   :  { %v1634_v29 = vsub.f32 %v4723_v45, %v1633_v11  ;;  %v1719_v36 = vand.u32 4294901760, %v1718_v23 }
 0x24b   :  { %3596 = vmatpush3.bf16.msra.mxu0 %v4729_v14  ;;  %v4796_v15 = vpack.c.bf16 %v1733_v30, %v1726_v8  ;;  %v4835_v8 = vsub.f32 %v4575_v12, %v1535_v62  ;;  %v4840_v30 = vsub.f32 %v4577_v44, %v1538_v1  ;;  %v1648_v12 = vsub.f32 %v4828_v59, %v1647_v20 }
 0x24c   :  { %v1635_v27 = vand.u32 4294901760, %v1634_v29  ;;  %v4794_v6 = vpack.c.bf16 %v1719_v36, %v1712_v25  ;;  %v4800_v29 = vpack.c.bf16 %v4723_v45, %v4718_v55  ;;  %v4860_v1 = vsub.f32 %v4596_v54, %v1541_v58 }
 0x24d   :  { %v1654_v62 = vand.u32 4294901760, %v4835_v8  ;;  %v1661_v44 = vand.u32 4294901760, %v4840_v30  ;;  %v1649_v63 = vand.u32 4294901760, %v1648_v12 }
 0x24e   :  { %v4739_v39 = vpack.c.bf16 %v1635_v27, %v1628_v35  ;;  %v4804_v35 = vpack.c.bf16 %v4744_v22, %v4742_v13  ;;  %v4808_v27 = vpack.c.bf16 %v4756_v16, %v4754_v9  ;;  %v5044_v13 = vand.u32 4294901760, %v4779_v31 }
 0x24f   :  { %v1655_v50 = vsub.f32 %v4835_v8, %v1654_v62  ;;  %v1662_v54 = vsub.f32 %v4840_v30, %v1661_v44  ;;  %v3701_v55 = vpack.c.bf16 %v1661_v44, %v1654_v62 }
 0x250   :  { %3598 = vmatprep.subr.bf16.mxu0 %v4739_v39 }
 0x251   :  { %v1656_v60 = vand.u32 4294901760, %v1655_v50  ;;  %v1663_v48 = vand.u32 4294901760, %v1662_v54 }
 0x317   :  { %v2970_v61 = vpop.f32.mrb[2].mxu1 }
 0x318   :  { %v3761_v23 = vadd.f32 %v2970_v61, %v815_v5  ;;  %v1490_v25 = vpop.f32.mrb[3].mxu1  ;;  %v4865_v61 = vsub.f32 %v4598_v4, %v1544_v24  ;;  %v1668_v4 = vand.u32 4294901760, %v4860_v1 }
 0x319   :  { %v3762_v36 = vadd.f32 %v1490_v25, %v815_v5  ;;  %v1641_v5 = vsub.f32 %v4823_v17, %v1640_v49 }
 0x31a   :  { %v1501_v10 = vmax.f32 %v3761_v23, 0.0  ;;  %v1675_v24 = vand.u32 4294901760, %v4865_v61  ;;  %v1669_v47 = vsub.f32 %v4860_v1, %v1668_v4 }
 0x31b   :  { %v1500_v57 = vmax.f32 %v3762_v36, 0.0 }
 0x31c   :  { %v4842_v43 = vand.u32 4294901760, %v1501_v10  ;;  %v1676_v19 = vsub.f32 %v4865_v61, %v1675_v24  ;;  %v3705_v45 = vpack.c.bf16 %v1675_v24, %v1668_v4 }
 0x31d   :  { %v4844_v2 = vand.u32 4294901760, %v1500_v57 }
 0x31e   :  { %v4854_v33 = vsub.f32 %v1501_v10, %v4842_v43  ;;  %v1642_v10 = vand.u32 4294901760, %v1641_v5  ;;  %v1677_v50 = vand.u32 4294901760, %v1676_v19  ;;  %v3637_v19 = vpack.c.bf16 %v4840_v30, %v4835_v8 }
 0x31f   :  { %v4868_v23 = vsub.f32 %v1500_v57, %v4844_v2 }
 0x320   :  { %v1615_v25 = vand.u32 4294901760, %v4854_v33  ;;  %v3601_v12 = vpack.c.bf16 %v1649_v63, %v1642_v10  ;;  %v1670_v63 = vand.u32 4294901760, %v1669_v47  ;;  %v3641_v47 = vpack.c.bf16 %v4865_v61, %v4860_v1 }
 0x321   :  { %v1605_v36 = vand.u32 4294901760, %v4868_v23 }
 0x322   :  { %v1616_v58 = vsub.f32 %v4854_v33, %v1615_v25  ;;  %v3609_v10 = vpack.c.bf16 %v1677_v50, %v1670_v63 }
 0x323   :  { %v1606_v57 = vsub.f32 %v4868_v23, %v1605_v36 }
 0x324   :  { %v1617_v53 = vand.u32 4294901760, %v1616_v58 }
 0x325   :  { %v1607_v5 = vand.u32 4294901760, %v1606_v57  ;;  %v3605_v57 = vpack.c.bf16 %v1663_v48, %v1656_v60  ;;  %v3693_v48 = vpack.c.bf16 %v1633_v11, %v1626_v37  ;;  %v5039_v37 = vand.u32 4294901760, %v4744_v22 }
 0x326   :  { %v5041_v60 = vand.u32 4294901760, %v4756_v16  ;;  %v5045_v22 = vand.u32 4294901760, %v4781_v3 }
 0x327   :  { %3003 = vmatprep.mubr.f32.mxu0 %v1607_v5  ;;  %v3709_v11 = vpack.c.bf16 %v5039_v37, %v1682_v46 }
 0x328   :  { %3004 = vmatmul.mubr.f32.vlgmr.msra.gmra.mrb[2].mxu0 %v1617_v53  ;;  %v5040_v53 = vand.u32 4294901760, %v4754_v9  ;;  %v3721_v46 = vpack.c.bf16 %v5045_v22, %v5044_v13 }
 0x329   :  { %3600 = vmatpush3.bf16.msra.mxu0 %v4739_v39  ;;  %3038 = vmatprep.mubr.f32.mxu0 %v4844_v2  ;;  %v3633_v39 = vpack.c.bf16 %v4828_v59, %v4823_v17 }
 0x32a   :  { %3602 = vmatprep.subr.bf16.mxu0 %v3601_v12 }
 0x32d   :  { %3604 = vmatpush3.bf16.msra.mxu0 %v3601_v12 }
 0x32e   :  { %3606 = vmatprep.subr.bf16.mxu0 %v3605_v57 }
 0x331   :  { %3608 = vmatpush3.bf16.msra.mxu0 %v3605_v57 }
 0x332   :  { %3610 = vmatprep.subr.bf16.mxu0 %v3609_v10 }
 0x335   :  { %3612 = vmatpush3.bf16.msra.mxu0 %v3609_v10 }
 0x336   :  { %3614 = vmatprep.subr.bf16.mxu0 %v4760_v41 }
 0x339   :  { %3616 = vmatpush3.bf16.msra.mxu0 %v4760_v41  ;;  %v3697_v41 = vpack.c.bf16 %v1647_v20, %v1640_v49 }
 0x33a   :  { %3618 = vmatprep.subr.bf16.mxu0 %v4774_v40 }
 0x33d   :  { %3620 = vmatpush3.bf16.msra.mxu0 %v4774_v40  ;;  %v3713_v40 = vpack.c.bf16 %v5041_v60, %v5040_v53 }
 0x33e   :  { %3622 = vmatprep.subr.bf16.mxu0 %v4794_v6 }
 0x341   :  { %3624 = vmatpush3.bf16.msra.mxu0 %v4794_v6  ;;  %v5042_v6 = vand.u32 4294901760, %v4768_v26 }
 0x342   :  { %3626 = vmatprep.subr.bf16.mxu0 %v4796_v15 }
 0x345   :  { %3628 = vmatpush3.bf16.msra.mxu0 %v4796_v15  ;;  %v5043_v15 = vand.u32 4294901760, %v4770_v32 }
 0x346   :  { %3630 = vmatprep.subr.bf16.mxu0 %v4800_v29 }
 0x348   :  { %3039 = vmatmul.mubr.f32.vlgmr.msra.gmra.mrb[2].mxu0 %v4842_v43 }
 0x349   :  { %3632 = vmatpush3.bf16.msra.mxu0 %v4800_v29  ;;  %3073 = vmatprep.mubr.f32.mxu0 %v4868_v23  ;;  %v3717_v29 = vpack.c.bf16 %v5043_v15, %v5042_v6 }
 0x34a   :  { %3634 = vmatprep.subr.bf16.mxu0 %v3633_v39 }
 0x34d   :  { %3636 = vmatpush3.bf16.msra.mxu0 %v3633_v39 }
 0x34e   :  { %3638 = vmatprep.subr.bf16.mxu0 %v3637_v19 }
 0x351   :  { %3640 = vmatpush3.bf16.msra.mxu0 %v3637_v19 }
 0x352   :  { %3642 = vmatprep.subr.bf16.mxu0 %v3641_v47 }
 0x355   :  { %3644 = vmatpush3.bf16.msra.mxu0 %v3641_v47 }
 0x356   :  { %3646 = vmatprep.subr.bf16.mxu0 %v4804_v35 }
 0x359   :  { %3648 = vmatpush3.bf16.msra.mxu0 %v4804_v35 }
 0x35a   :  { %3650 = vmatprep.subr.bf16.mxu0 %v4808_v27 }
 0x35d   :  { %3652 = vmatpush3.bf16.msra.mxu0 %v4808_v27 }
 0x35e   :  { %3654 = vmatprep.subr.bf16.mxu0 %v4812_v21 }
 0x361   :  { %3656 = vmatpush3.bf16.msra.mxu0 %v4812_v21 }
 0x362   :  { %3658 = vmatprep.subr.bf16.mxu0 %v4816_v7 }
 0x365   :  { %3660 = vmatpush3.bf16.msra.mxu0 %v4816_v7 }
 0x366   :  { %3662 = vmatprep.subr.bf16.mxu0 %v4586_v56 }
 0x368   :  { %3074 = vmatmul.mubr.f32.vlgmr.msra.gmra.mrb[2].mxu0 %v4854_v33 }
 0x369   :  { %3664 = vmatpush3.bf16.msra.mxu0 %v4586_v56  ;;  %3108 = vmatprep.mubr.f32.mxu0 %v1605_v36 }
 0x36a   :  { %3666 = vmatprep.subr.bf16.mxu0 %v4594_v0 }
 0x36d   :  { %3668 = vmatpush3.bf16.msra.mxu0 %v4594_v0 }
 0x36e   :  { %3670 = vmatprep.subr.bf16.mxu0 %v4609_v51 }
 0x371   :  { %3672 = vmatpush3.bf16.msra.mxu0 %v4609_v51 }
 0x372   :  { %3674 = vmatprep.subr.bf16.mxu0 %v4619_v52 }
 0x375   :  { %3676 = vmatpush3.bf16.msra.mxu0 %v4619_v52 }
 0x376   :  { %3678 = vmatprep.subr.bf16.mxu0 %v4705_v28 }
 0x379   :  { %3680 = vmatpush3.bf16.msra.mxu0 %v4705_v28 }
 0x37a   :  { %3682 = vmatprep.subr.bf16.mxu0 %v4709_v42 }
 0x37d   :  { %3684 = vmatpush3.bf16.msra.mxu0 %v4709_v42 }
 0x37e   :  { %3686 = vmatprep.subr.bf16.mxu0 %v4713_v34 }
 0x381   :  { %3688 = vmatpush3.bf16.msra.mxu0 %v4713_v34 }
 0x382   :  { %3690 = vmatprep.subr.bf16.mxu0 %v4729_v14 }
 0x385   :  { %3692 = vmatpush3.bf16.msra.mxu0 %v4729_v14 }
 0x386   :  { %3694 = vmatprep.subr.bf16.mxu0 %v3693_v48 }
 0x388   :  { %3109 = vmatmul.mubr.f32.vlgmr.msra.gmra.mrb[2].mxu0 %v1615_v25 }
 0x389   :  { %3696 = vmatpush3.bf16.msra.mxu0 %v3693_v48  ;;  %3143 = vmatprep.mubr.f32.mxu0 %v4844_v2 }
 0x38a   :  { %3698 = vmatprep.subr.bf16.mxu0 %v3697_v41 }
 0x38d   :  { %3700 = vmatpush3.bf16.msra.mxu0 %v3697_v41 }
 0x38e   :  { %3702 = vmatprep.subr.bf16.mxu0 %v3701_v55 }
 0x391   :  { %3704 = vmatpush3.bf16.msra.mxu0 %v3701_v55 }
 0x392   :  { %3706 = vmatprep.subr.bf16.mxu0 %v3705_v45 }
 0x395   :  { %3708 = vmatpush3.bf16.msra.mxu0 %v3705_v45 }
 0x396   :  { %3710 = vmatprep.subr.bf16.mxu0 %v3709_v11 }
 0x399   :  { %3712 = vmatpush3.bf16.msra.mxu0 %v3709_v11 }
 0x39a   :  { %3714 = vmatprep.subr.bf16.mxu0 %v3713_v40 }
 0x39d   :  { %3716 = vmatpush3.bf16.msra.mxu0 %v3713_v40 }
 0x39e   :  { %3718 = vmatprep.subr.bf16.mxu0 %v3717_v29 }
 0x3a1   :  { %3720 = vmatpush3.bf16.msra.mxu0 %v3717_v29 }
 0x3a2   :  { %3722 = vmatprep.subr.bf16.mxu0 %v3721_v46 }
 0x3a5   :  { %3724 = vmatpush3.bf16.msra.mxu0 %v3721_v46 }
 0x3a6   :  { %3726 = vmatprep.subr.bf16.mxu0 %v4586_v56 }
 0x3a8   :  { %3144 = vmatmul.mubr.f32.vlgmr.msra.gmra.mrb[2].mxu0 %v4842_v43 }
 0x3a9   :  { %3728 = vmatpush3.bf16.msra.mxu0 %v4586_v56  ;;  %3178 = vmatprep.mubr.f32.mxu0 %v4844_v2 }
 0x3aa   :  { %3730 = vmatprep.subr.bf16.mxu0 %v4594_v0 }
 0x3ad   :  { %3732 = vmatpush3.bf16.msra.mxu0 %v4594_v0 }
 0x3ae   :  { %3734 = vmatprep.subr.bf16.mxu0 %v4609_v51 }
 0x3b1   :  { %3736 = vmatpush3.bf16.msra.mxu0 %v4609_v51 }
 0x3b2   :  { %3738 = vmatprep.subr.bf16.mxu0 %v4619_v52 }
 0x3b5   :  { %3740 = vmatpush3.bf16.msra.mxu0 %v4619_v52  ;;  %v1520_v52 = vsub.s32 2, %v4470_v38 }
 0x3b6   :  { %3742 = vmatprep.subr.bf16.mxu0 %v4705_v28 }
 0x3b7   :  { %v1521_v51 = vrot.slane %v4473_v18, %v1520_v52 }
 0x3b9   :  { %3744 = vmatpush3.bf16.msra.mxu0 %v4705_v28 }
 0x3ba   :  { %3746 = vmatprep.subr.bf16.mxu0 %v4709_v42 }
 0x3bd   :  { %3748 = vmatpush3.bf16.msra.mxu0 %v4709_v42 }
 0x3be   :  { %3750 = vmatprep.subr.bf16.mxu0 %v4713_v34 }
 0x3c1   :  { %3752 = vmatpush3.bf16.msra.mxu0 %v4713_v34 }
 0x3c2   :  { %3754 = vmatprep.subr.bf16.mxu0 %v4729_v14 }
 0x3c5   :  { %3756 = vmatpush3.bf16.msra.mxu0 %v4729_v14 }
 0x3c8   :  { %3179 = vmatmul.mubr.f32.vlgmr.msra.gmra.mrb[2].mxu0 %v4842_v43 }
 0x49b   :  { %v3180_v56 = vpop.f32.mrb[2].mxu0 }
 0x49c   :  { %v3763_v0 = vadd.f32 %v3180_v56, %v1521_v51  ;;  %v2196_v28 = vpop.f32.mrb[3].mxu0 }
 0x49d   :  { %v3764_v42 = vadd.f32 %v2196_v28, %v1521_v51 }
 0x49e   :  { %2207 = vst [vmem:[#allocation11 + $0x8] sm:$0xff] %v3763_v0 }
 0x49f   :  { %2206 = vst [vmem:[#allocation11] sm:$0xff] %v3764_v42 }
 0x4a0   :  { %3922 = shalt.err (!%p3919_p2)
}
 0x4a1   :  { %s3923_s30 = scalar_lea.hbm %s5011_s5, 256 }
 0x4a2   :  { %p3924_p3 = scmp.ne.s32.totalorder %s5011_s5, %s3923_s30  ;;  %p3927_p4 = scmp.lt.u32.totalorder %s3923_s30, %s5011_s5 }
 0x4a4   :  { %p3929_p5 = pnand %p3927_p4, %p3924_p3 }
 0x4a6   :  { %3932 = shalt.err (!%p3929_p5)
}
 0x4a7   :  { %2219 = dma.vmem_to_hbm [thread:$0]  %s2214_s27, 256, %s5011_s5, [#allocation4], %s3944_s16, %s3944_s16, %s3945_s17  }
 0x4a8   :  { %3939 = dma.done.wait [#allocation4], 256  }
 0x4a9   :  { %3940 = vsyncadd [#allocation4], 4294967040 }
 0x4aa   :  { %2223 = vsyncpa [#allocation3], 1 }
 0x4ab   :  { %2224 = vsyncpa [#allocation6], 1 }
 0x4ac   :  { %2225 = vsyncpa [#allocation9], 1 }
 0x4ad   :  { %2226 = vsyncpa [#allocation4], 1 }

</bundles_post_ra>
